<compile_context>
chip_gen: v7x
topology: tpu7x:2x2x1
jax: 0.10.0
libtpu: 0.0.40
codegen_flags: <defaults>
</compile_context>

<pallas_src>
import math
import functools

import jax
import jax.numpy as jnp
import numpy as np
from jax.experimental import pallas as pl
from jax.experimental.pallas import tpu as pltpu


def _exact_gelu(x):
    # PyTorch F.gelu default = exact erf-based gelu.
    return 0.5 * x * (1.0 + jax.lax.erf(x * (1.0 / math.sqrt(2.0))))


# -----------------------------------------------------------------------------
# Pallas kernel (fused: attention + residual + FFN + residual)
# grid = (B // Bt, F // tF); axis 0 "parallel", axis 1 "arbitrary" (d_ff tiles)
# -----------------------------------------------------------------------------
def encoder_layer_kernel(xr_ref, xi_ref,
                         w1r_ref, w1i_ref, b1r_ref, b1i_ref,
                         w2r_ref, w2i_ref, b2_ref,
                         o_ref, a_ref,
                         x1_scratch, acc_scratch,
                         *, scale, compute_dtype, approx_recip):
    f = pl.program_id(1)

    # ---- attention + first residual: once per batch tile (f == 0) -----------
    @pl.when(f == 0)
    def _attention():
        x = jnp.concatenate([xr_ref[...], xi_ref[...]], axis=-1)   # (Bt, L, 2D) f32
        xc = x.astype(compute_dtype)                                # bf16 for MXU
        # scores = Re(Q conj(K)^T)/sqrt(D) = X_cat @ X_cat^T * scale (f32 accum)
        s = jnp.einsum("bld,bmd->blm", xc, xc,
                       preferred_element_type=jnp.float32) * scale
        # manual softmax; reciprocal goes to the EUP slot (approx in bf16 mode)
        m = jnp.max(s, axis=-1, keepdims=True)
        e = jnp.exp(s - m)
        p = e * pl.reciprocal(jnp.sum(e, axis=-1, keepdims=True), approx=approx_recip)
        a_ref[...] = p.astype(a_ref.dtype)
        # new_x = A @ [Vr | Vi]  -> both complex parts in one (batched) matmul
        new_x = jnp.einsum("blm,bmd->bld", p.astype(compute_dtype), xc,
                           preferred_element_type=jnp.float32)
        x1 = x + new_x                          # residual; dropout = identity (eval)
        x1_scratch[...] = x1.reshape(x1_scratch.shape)      # (Bt*L, 2D) f32
        acc_scratch[...] = jnp.zeros_like(acc_scratch)

    # ---- FFN on this d_ff tile: conv1 -> ComplexGELU -> conv2 (accumulate) ---
    # complex linears via stacked real weights:
    #   h_r = x1_cat @ [[W1r],[-W1i]],  h_i = x1_cat @ [[W1i],[W1r]]
    #   y_cat += gelu(h_r) @ [W2r|W2i] + gelu(h_i) @ [-W2i|W2r]
    x1c = x1_scratch[...].astype(compute_dtype)             # (Bt*L, 2D)
    h_r = jnp.dot(x1c, w1r_ref[...], preferred_element_type=jnp.float32) + b1r_ref[...]
    h_i = jnp.dot(x1c, w1i_ref[...], preferred_element_type=jnp.float32) + b1i_ref[...]
    g_r = _exact_gelu(h_r).astype(compute_dtype)
    g_i = _exact_gelu(h_i).astype(compute_dtype)
    acc_scratch[...] += (
        jnp.dot(g_r, w2r_ref[...], preferred_element_type=jnp.float32)
        + jnp.dot(g_i, w2i_ref[...], preferred_element_type=jnp.float32))

    # ---- second residual + lane-dense (2D wide) store on the last d_ff tile --
    @pl.when(f == pl.num_programs(1) - 1)
    def _finalize():
        y = acc_scratch[...] + b2_ref[...]
        o_ref[...] = (x1_scratch[...] + y).reshape(o_ref.shape).astype(o_ref.dtype)


# -----------------------------------------------------------------------------
# One-time parameter packing (hoisted out of the per-call forward path)
# -----------------------------------------------------------------------------
def pack_params(params, compute_dtype=jnp.bfloat16):
    w1r, w1i = params["w1_r"], params["w1_i"]
    w2r, w2i = params["w2_r"], params["w2_i"]
    cd = compute_dtype
    return {
        "w1g_r": jnp.concatenate([w1r, -w1i], axis=0).astype(cd),   # (2D, F)
        "w1g_i": jnp.concatenate([w1i, w1r], axis=0).astype(cd),    # (2D, F)
        "b1_r": params["b1_r"].astype(jnp.float32),                 # (1, F)
        "b1_i": params["b1_i"].astype(jnp.float32),                 # (1, F)
        "w2g_r": jnp.concatenate([w2r, w2i], axis=1).astype(cd),    # (F, 2D)
        "w2g_i": jnp.concatenate([-w2i, w2r], axis=1).astype(cd),   # (F, 2D)
        "b2": jnp.concatenate([params["b2_r"], params["b2_i"]],
                              axis=1).astype(jnp.float32),          # (1, 2D)
    }


# -----------------------------------------------------------------------------
# Wrapper
# -----------------------------------------------------------------------------
def encoder_layer_forward(x_r, x_i, packed, *, compute_dtype=jnp.bfloat16,
                          attn_dtype=jnp.float32, batch_tile=None, f_tile=None):
    B, L, D = x_r.shape
    twoD = 2 * D
    F = packed["w1g_r"].shape[1]

    # Batch tile: fold batches so the FFN matmul M-dim is MXU-friendly
    # (target ~256 rows for v6e/v7x; pass batch_tile explicitly for 128 on v5e).
    if batch_tile is None:
        bt = B
        while bt % 2 == 0 and (bt // 2) * L >= 256:
            bt //= 2
    else:
        bt = batch_tile
    assert B % bt == 0, "batch_tile must divide B"

    # d_ff tile: keep resident weight slices bounded (v7x VMEM = 64 MiB).
    if f_tile is None:
        tf = F
        if F > 1024:
            for cand in (1024, 512, 256, 128):
                if F % cand == 0:
                    tf = cand
                    break
    else:
        tf = f_tile
    assert F % tf == 0 and (tf == F or tf % 128 == 0)
    n_f = F // tf

    # Weights fully resident (constant index map) -> single buffer is enough;
    # tiled d_ff -> keep default double buffering so next slice prefetches.
    weight_mode = pl.Buffered(1) if n_f == 1 else None

    def wspec(shape, index_map):
        if weight_mode is None:
            return pl.BlockSpec(shape, index_map)
        return pl.BlockSpec(shape, index_map, pipeline_mode=weight_mode)

    # Rough resident-VMEM estimate -> raise the scoped limit when needed (v5e/v6e).
    w_item = jnp.dtype(compute_dtype).itemsize
    a_item = jnp.dtype(attn_dtype).itemsize
    wbuf = 1 if n_f == 1 else 2
    vmem_est = (
        wbuf * (2 * twoD * tf + 2 * tf * twoD) * w_item     # stacked weights
        + wbuf * (2 * tf + twoD) * 4                         # biases (f32)
        + 2 * 2 * bt * L * D * 4                             # x_r, x_i (double-buffered)
        + 2 * bt * L * (twoD * 4 + L * a_item)               # outputs (double-buffered)
        + 2 * bt * L * twoD * 4                              # f32 scratches
        + 4 * bt * L * tf * 4                                # h/g intermediates
    )
    vmem_limit = None
    if vmem_est > 32 * 1024 * 1024:
        vmem_limit = min(int(vmem_est * 1.5), 100 * 1024 * 1024)

    kernel = functools.partial(
        encoder_layer_kernel,
        scale=1.0 / math.sqrt(D),
        compute_dtype=compute_dtype,
        approx_recip=(jnp.dtype(compute_dtype) == jnp.dtype(jnp.bfloat16)))

    out_cat, attn = pl.pallas_call(
        kernel,
        out_shape=(jax.ShapeDtypeStruct((B, L, twoD), jnp.float32),
                   jax.ShapeDtypeStruct((B, L, L), attn_dtype)),
        grid=(B // bt, n_f),
        in_specs=[
            pl.BlockSpec((bt, L, D), lambda b, f: (b, 0, 0)),     # x_real
            pl.BlockSpec((bt, L, D), lambda b, f: (b, 0, 0)),     # x_imag
            wspec((twoD, tf), lambda b, f: (0, f)),                # w1g_r
            wspec((twoD, tf), lambda b, f: (0, f)),                # w1g_i
            wspec((1, tf), lambda b, f: (0, f)),                   # b1_r
            wspec((1, tf), lambda b, f: (0, f)),                   # b1_i
            wspec((tf, twoD), lambda b, f: (f, 0)),                # w2g_r
            wspec((tf, twoD), lambda b, f: (f, 0)),                # w2g_i
            wspec((1, twoD), lambda b, f: (0, 0)),                 # b2
        ],
        out_specs=(pl.BlockSpec((bt, L, twoD), lambda b, f: (b, 0, 0)),
                   pl.BlockSpec((bt, L, L), lambda b, f: (b, 0, 0))),
        scratch_shapes=[pltpu.VMEM((bt * L, twoD), jnp.float32),   # x1 (flat)
                        pltpu.VMEM((bt * L, twoD), jnp.float32)],  # conv2 accumulator
        compiler_params=pltpu.CompilerParams(
            dimension_semantics=("parallel", "arbitrary"),
            vmem_limit_bytes=vmem_limit),
    )(x_r, x_i,
      packed["w1g_r"], packed["w1g_i"], packed["b1_r"], packed["b1_i"],
      packed["w2g_r"], packed["w2g_i"], packed["b2"])

    out = jax.lax.complex(out_cat[..., :D], out_cat[..., D:])
    return out, attn


# -----------------------------------------------------------------------------
# Pure-JAX reference (for correctness check)
# -----------------------------------------------------------------------------
def reference_forward(x_r, x_i, params):
    B, L, D = x_r.shape
    x = x_r + 1j * x_i.astype(jnp.complex64)
    scores = (jnp.einsum("bld,bmd->blm", x_r, x_r)
              + jnp.einsum("bld,bmd->blm", x_i, x_i)) / math.sqrt(D)
    a = jax.nn.softmax(scores, axis=-1)
    new_x = jnp.einsum("blm,bmd->bld", a.astype(jnp.complex64), x)
    x1 = x + new_x
    w1 = params["w1_r"] + 1j * params["w1_i"]
    b1 = params["b1_r"] + 1j * params["b1_i"]
    w2 = params["w2_r"] + 1j * params["w2_i"]
    b2 = params["b2_r"] + 1j * params["b2_i"]
    h = jnp.einsum("bld,df->blf", x1, w1) + b1[0]
    g = _exact_gelu(h.real) + 1j * _exact_gelu(h.imag)
    y = jnp.einsum("blf,fd->bld", g, w2) + b2[0]
    return x1 + y, a


# -----------------------------------------------------------------------------
# Parameter init (deterministic, PyTorch nn.Linear-style uniform bounds)
# -----------------------------------------------------------------------------
def init_params(key, d_model, d_ff):
    ks = jax.random.split(key, 8)
    bnd1 = 1.0 / math.sqrt(d_model)
    bnd2 = 1.0 / math.sqrt(d_ff)
    u = lambda k, shape, b: jax.random.uniform(k, shape, jnp.float32, -b, b)
    # weights stored as [in, out] (i.e. W^T of the PyTorch [out, in] layout)
    return {
        "w1_r": u(ks[0], (d_model, d_ff), bnd1),
        "w1_i": u(ks[1], (d_model, d_ff), bnd1),
        "b1_r": u(ks[2], (1, d_ff), bnd1),
        "b1_i": u(ks[3], (1, d_ff), bnd1),
        "w2_r": u(ks[4], (d_ff, d_model), bnd2),
        "w2_i": u(ks[5], (d_ff, d_model), bnd2),
        "b2_r": u(ks[6], (1, d_model), bnd2),
        "b2_i": u(ks[7], (1, d_model), bnd2),
    }


if __name__ == "__main__":
    key = jax.random.PRNGKey(0)

    # ---- Test A: f32 path, multi-step batch axis, fully-resident Buffered(1)
    #      weights (tight numerical check vs complex reference). ----
    B, L, D = 2, 8, 32
    d_ff = 4 * D
    kx_r, kx_i, kp = jax.random.split(key, 3)
    x_r = jax.random.normal(kx_r, (B, L, D), jnp.float32)
    x_i = jax.random.normal(kx_i, (B, L, D), jnp.float32)
    params = init_params(kp, D, d_ff)

    packed_f32 = pack_params(params, compute_dtype=jnp.float32)     # one-time prep
    out, attn = encoder_layer_forward(x_r, x_i, packed_f32,
                                      compute_dtype=jnp.float32,
                                      batch_tile=1)                 # grid = (2, 1)
    out = jax.block_until_ready(out)
    attn = jax.block_until_ready(attn)

    ref_out, ref_attn = reference_forward(x_r, x_i, params)
    np.testing.assert_allclose(np.asarray(out), np.asarray(ref_out),
                               rtol=1e-4, atol=1e-4)
    np.testing.assert_allclose(np.asarray(attn), np.asarray(ref_attn),
                               rtol=1e-4, atol=1e-4)

    # ---- Test B: bf16 MXU path, batch-tiled + d_ff-tiled accumulation
    #      (exercises the pl.when init/finalize over the F grid axis). ----
    B2, L2, D2, F2 = 4, 8, 32, 256
    k2 = jax.random.split(key, 3)
    x_r2 = jax.random.normal(k2[0], (B2, L2, D2), jnp.float32)
    x_i2 = jax.random.normal(k2[1], (B2, L2, D2), jnp.float32)
    params2 = init_params(k2[2], D2, F2)

    packed_bf16 = pack_params(params2, compute_dtype=jnp.bfloat16)   # one-time prep
    out2, attn2 = encoder_layer_forward(x_r2, x_i2, packed_bf16,
                                        compute_dtype=jnp.bfloat16,
                                        batch_tile=2, f_tile=128)    # grid = (2, 2)
    out2 = jax.block_until_ready(out2)
    attn2 = jax.block_until_ready(attn2)

    ref_out2, ref_attn2 = reference_forward(x_r2, x_i2, params2)
    np.testing.assert_allclose(np.asarray(out2), np.asarray(ref_out2),
                               rtol=1e-1, atol=1e-1)   # bf16 MXU inputs, f32 accum
    np.testing.assert_allclose(np.asarray(attn2), np.asarray(ref_attn2),
                               rtol=2e-2, atol=2e-2)

    print("KERNEL_OK")
</pallas_src>

<mosaic_0001>
module attributes {stable_mosaic.version = 11 : i64} {
  func.func @encoder_layer_kernel(%arg0: i32, %arg1: i32, %arg2: memref<1x8x32xf32, #tpu.memory_space<vmem>>, %arg3: memref<1x8x32xf32, #tpu.memory_space<vmem>>, %arg4: memref<64x128xf32, #tpu.memory_space<vmem>>, %arg5: memref<64x128xf32, #tpu.memory_space<vmem>>, %arg6: memref<1x128xf32, #tpu.memory_space<vmem>>, %arg7: memref<1x128xf32, #tpu.memory_space<vmem>>, %arg8: memref<128x64xf32, #tpu.memory_space<vmem>>, %arg9: memref<128x64xf32, #tpu.memory_space<vmem>>, %arg10: memref<1x64xf32, #tpu.memory_space<vmem>>, %arg11: memref<1x8x64xf32, #tpu.memory_space<vmem>>, %arg12: memref<1x8x8xf32, #tpu.memory_space<vmem>>, %arg13: memref<8x64xf32, #tpu.memory_space<vmem>>, %arg14: memref<8x64xf32, #tpu.memory_space<vmem>>) attributes {dimension_semantics = [#tpu.dimension_semantics<parallel>, #tpu.dimension_semantics<arbitrary>], iteration_bounds = array<i64: 2, 1>, scalar_prefetch = 0 : i64, scratch_operands = 2 : i64, tpu.core_type = #tpu.core_type<tc>, window_params = [{transform_indices = @transform_0, window_bounds = array<i64: 1, 8, 32>}, {transform_indices = @transform_1, window_bounds = array<i64: 1, 8, 32>}, {pipeline_mode = #tpu.pipeline_mode<synchronous>, transform_indices = @transform_2, window_bounds = array<i64: 64, 128>}, {pipeline_mode = #tpu.pipeline_mode<synchronous>, transform_indices = @transform_3, window_bounds = array<i64: 64, 128>}, {pipeline_mode = #tpu.pipeline_mode<synchronous>, transform_indices = @transform_4, window_bounds = array<i64: 1, 128>}, {pipeline_mode = #tpu.pipeline_mode<synchronous>, transform_indices = @transform_5, window_bounds = array<i64: 1, 128>}, {pipeline_mode = #tpu.pipeline_mode<synchronous>, transform_indices = @transform_6, window_bounds = array<i64: 128, 64>}, {pipeline_mode = #tpu.pipeline_mode<synchronous>, transform_indices = @transform_7, window_bounds = array<i64: 128, 64>}, {pipeline_mode = #tpu.pipeline_mode<synchronous>, transform_indices = @transform_8, window_bounds = array<i64: 1, 64>}, {transform_indices = @transform_9, window_bounds = array<i64: 1, 8, 64>}, {transform_indices = @transform_10, window_bounds = array<i64: 1, 8, 8>}]} {
    %c0_i32 = arith.constant 0 : i32
    %0 = arith.cmpi eq, %arg1, %c0_i32 : i32
    %1 = arith.extui %0 : i1 to i32
    %c0_i32_0 = arith.constant 0 : i32
    %2 = arith.cmpi ne, %1, %c0_i32_0 : i32
    scf.if %2 {
      %c0_29 = arith.constant 0 : index
      %c0_30 = arith.constant 0 : index
      %c0_31 = arith.constant 0 : index
      %41 = vector.load %arg2[%c0_29, %c0_30, %c0_31] : memref<1x8x32xf32, #tpu.memory_space<vmem>>, vector<1x8x32xf32>
      %c0_32 = arith.constant 0 : index
      %c0_33 = arith.constant 0 : index
      %c0_34 = arith.constant 0 : index
      %42 = vector.load %arg3[%c0_32, %c0_33, %c0_34] : memref<1x8x32xf32, #tpu.memory_space<vmem>>, vector<1x8x32xf32>
      %43 = tpu.concatenate %41, %42 in 2 : vector<1x8x32xf32>, vector<1x8x32xf32> -> vector<1x8x64xf32>
      "tpu.trace_start"() <{level = 10 : i32, message = "bld,bmd->blm"}> : () -> ()
      %cst_35 = arith.constant dense<0.000000e+00> : vector<1x8x8xf32>
      %44 = tpu.matmul %43, %43, %cst_35 {dimension_numbers = #tpu.dot_dimension_numbers<[2], [2], [1], [1], [0, 0, 0, 1, 1, 1], [0], [0]>} : vector<1x8x64xf32>, vector<1x8x64xf32>, vector<1x8x8xf32> -> vector<1x8x8xf32>
      "tpu.trace_stop"() : () -> ()
      %cst_36 = arith.constant 0.176776692 : f32
      %45 = vector.broadcast %cst_36 : f32 to vector<1x8x8xf32>
      %46 = arith.mulf %44, %45 : vector<1x8x8xf32>
      %cst_37 = arith.constant dense<0xFF800000> : vector<1x8xf32>
      %47 = vector.multi_reduction <maximumf>, %46, %cst_37 [2] : vector<1x8x8xf32> to vector<1x8xf32>
      %48 = vector.shape_cast %47 : vector<1x8xf32> to vector<1x8x1xf32>
      %49 = vector.broadcast %48 : vector<1x8x1xf32> to vector<1x8x8xf32>
      %50 = arith.subf %46, %49 : vector<1x8x8xf32>
      %51 = math.exp %50 : vector<1x8x8xf32>
      %cst_38 = arith.constant dense<0.000000e+00> : vector<1x8xf32>
      %52 = vector.multi_reduction <add>, %51, %cst_38 [2] : vector<1x8x8xf32> to vector<1x8xf32>
      %53 = vector.shape_cast %52 : vector<1x8xf32> to vector<1x8x1xf32>
      %54 = tpu.reciprocal %53 : vector<1x8x1xf32> -> vector<1x8x1xf32>
      %55 = vector.broadcast %54 : vector<1x8x1xf32> to vector<1x8x8xf32>
      %56 = arith.mulf %51, %55 : vector<1x8x8xf32>
      %c0_39 = arith.constant 0 : index
      %c0_40 = arith.constant 0 : index
      %c0_41 = arith.constant 0 : index
      %57 = vector.load %arg12[%c0_39, %c0_40, %c0_41] : memref<1x8x8xf32, #tpu.memory_space<vmem>>, vector<1x8x8xf32>
      tpu.vector_store %arg12[%c0_39, %c0_40, %c0_41], %56 {strides = array<i32>} : memref<1x8x8xf32, #tpu.memory_space<vmem>>, vector<1x8x8xf32>,
      "tpu.trace_start"() <{level = 10 : i32, message = "blm,bmd->bld"}> : () -> ()
      %cst_42 = arith.constant dense<0.000000e+00> : vector<1x8x64xf32>
      %58 = tpu.matmul %56, %43, %cst_42 {dimension_numbers = #tpu.dot_dimension_numbers<[2], [1], [1], [2], [0, 0, 0, 1, 1, 2], [0], [0]>} : vector<1x8x8xf32>, vector<1x8x64xf32>, vector<1x8x64xf32> -> vector<1x8x64xf32>
      "tpu.trace_stop"() : () -> ()
      %59 = arith.addf %43, %58 : vector<1x8x64xf32>
      %60 = vector.shape_cast %59 : vector<1x8x64xf32> to vector<8x64xf32>
      %c0_43 = arith.constant 0 : index
      %c0_44 = arith.constant 0 : index
      %61 = vector.load %arg13[%c0_43, %c0_44] : memref<8x64xf32, #tpu.memory_space<vmem>>, vector<8x64xf32>
      tpu.vector_store %arg13[%c0_43, %c0_44], %60 {strides = array<i32>} : memref<8x64xf32, #tpu.memory_space<vmem>>, vector<8x64xf32>,
      %cst_45 = arith.constant 0.000000e+00 : f32
      %62 = vector.broadcast %cst_45 : f32 to vector<8x64xf32>
      %c0_46 = arith.constant 0 : index
      %c0_47 = arith.constant 0 : index
      %63 = vector.load %arg14[%c0_46, %c0_47] : memref<8x64xf32, #tpu.memory_space<vmem>>, vector<8x64xf32>
      tpu.vector_store %arg14[%c0_46, %c0_47], %62 {strides = array<i32>} : memref<8x64xf32, #tpu.memory_space<vmem>>, vector<8x64xf32>,
    } else {
    }
    %c0 = arith.constant 0 : index
    %c0_1 = arith.constant 0 : index
    %3 = vector.load %arg13[%c0, %c0_1] : memref<8x64xf32, #tpu.memory_space<vmem>>, vector<8x64xf32>
    %c0_2 = arith.constant 0 : index
    %c0_3 = arith.constant 0 : index
    %4 = vector.load %arg4[%c0_2, %c0_3] : memref<64x128xf32, #tpu.memory_space<vmem>>, vector<64x128xf32>
    %cst = arith.constant dense<0.000000e+00> : vector<8x128xf32>
    %5 = tpu.matmul %3, %4, %cst {dimension_numbers = #tpu.dot_dimension_numbers<[1], [0], [0], [1], [0, 0, 1, 1], [], []>} : vector<8x64xf32>, vector<64x128xf32>, vector<8x128xf32> -> vector<8x128xf32>
    %c0_4 = arith.constant 0 : index
    %c0_5 = arith.constant 0 : index
    %6 = vector.load %arg6[%c0_4, %c0_5] : memref<1x128xf32, #tpu.memory_space<vmem>>, vector<1x128xf32>
    %7 = vector.broadcast %6 : vector<1x128xf32> to vector<8x128xf32>
    %8 = arith.addf %5, %7 : vector<8x128xf32>
    %c0_6 = arith.constant 0 : index
    %c0_7 = arith.constant 0 : index
    %9 = vector.load %arg5[%c0_6, %c0_7] : memref<64x128xf32, #tpu.memory_space<vmem>>, vector<64x128xf32>
    %cst_8 = arith.constant dense<0.000000e+00> : vector<8x128xf32>
    %10 = tpu.matmul %3, %9, %cst_8 {dimension_numbers = #tpu.dot_dimension_numbers<[1], [0], [0], [1], [0, 0, 1, 1], [], []>} : vector<8x64xf32>, vector<64x128xf32>, vector<8x128xf32> -> vector<8x128xf32>
    %c0_9 = arith.constant 0 : index
    %c0_10 = arith.constant 0 : index
    %11 = vector.load %arg7[%c0_9, %c0_10] : memref<1x128xf32, #tpu.memory_space<vmem>>, vector<1x128xf32>
    %12 = vector.broadcast %11 : vector<1x128xf32> to vector<8x128xf32>
    %13 = arith.addf %10, %12 : vector<8x128xf32>
    %cst_11 = arith.constant 5.000000e-01 : f32
    %14 = vector.broadcast %cst_11 : f32 to vector<8x128xf32>
    %15 = arith.mulf %14, %8 : vector<8x128xf32>
    %cst_12 = arith.constant 0.707106769 : f32
    %16 = vector.broadcast %cst_12 : f32 to vector<8x128xf32>
    %17 = arith.mulf %8, %16 : vector<8x128xf32>
    %18 = math.erf %17 : vector<8x128xf32>
    %cst_13 = arith.constant 1.000000e+00 : f32
    %19 = vector.broadcast %cst_13 : f32 to vector<8x128xf32>
    %20 = arith.addf %19, %18 : vector<8x128xf32>
    %21 = arith.mulf %15, %20 : vector<8x128xf32>
    %cst_14 = arith.constant 5.000000e-01 : f32
    %22 = vector.broadcast %cst_14 : f32 to vector<8x128xf32>
    %23 = arith.mulf %22, %13 : vector<8x128xf32>
    %cst_15 = arith.constant 0.707106769 : f32
    %24 = vector.broadcast %cst_15 : f32 to vector<8x128xf32>
    %25 = arith.mulf %13, %24 : vector<8x128xf32>
    %26 = math.erf %25 : vector<8x128xf32>
    %cst_16 = arith.constant 1.000000e+00 : f32
    %27 = vector.broadcast %cst_16 : f32 to vector<8x128xf32>
    %28 = arith.addf %27, %26 : vector<8x128xf32>
    %29 = arith.mulf %23, %28 : vector<8x128xf32>
    %c0_17 = arith.constant 0 : index
    %c0_18 = arith.constant 0 : index
    %30 = vector.load %arg14[%c0_17, %c0_18] : memref<8x64xf32, #tpu.memory_space<vmem>>, vector<8x64xf32>
    %c0_19 = arith.constant 0 : index
    %c0_20 = arith.constant 0 : index
    %31 = vector.load %arg8[%c0_19, %c0_20] : memref<128x64xf32, #tpu.memory_space<vmem>>, vector<128x64xf32>
    %cst_21 = arith.constant dense<0.000000e+00> : vector<8x64xf32>
    %32 = tpu.matmul %21, %31, %cst_21 {dimension_numbers = #tpu.dot_dimension_numbers<[1], [0], [0], [1], [0, 0, 1, 1], [], []>} : vector<8x128xf32>, vector<128x64xf32>, vector<8x64xf32> -> vector<8x64xf32>
    %c0_22 = arith.constant 0 : index
    %c0_23 = arith.constant 0 : index
    %33 = vector.load %arg9[%c0_22, %c0_23] : memref<128x64xf32, #tpu.memory_space<vmem>>, vector<128x64xf32>
    %cst_24 = arith.constant dense<0.000000e+00> : vector<8x64xf32>
    %34 = tpu.matmul %29, %33, %cst_24 {dimension_numbers = #tpu.dot_dimension_numbers<[1], [0], [0], [1], [0, 0, 1, 1], [], []>} : vector<8x128xf32>, vector<128x64xf32>, vector<8x64xf32> -> vector<8x64xf32>
    %35 = arith.addf %32, %34 : vector<8x64xf32>
    %36 = arith.addf %30, %35 : vector<8x64xf32>
    %c0_25 = arith.constant 0 : index
    %c0_26 = arith.constant 0 : index
    %37 = vector.load %arg14[%c0_25, %c0_26] : memref<8x64xf32, #tpu.memory_space<vmem>>, vector<8x64xf32>
    tpu.vector_store %arg14[%c0_25, %c0_26], %36 {strides = array<i32>} : memref<8x64xf32, #tpu.memory_space<vmem>>, vector<8x64xf32>,
    %c0_i32_27 = arith.constant 0 : i32
    %38 = arith.cmpi eq, %arg1, %c0_i32_27 : i32
    %39 = arith.extui %38 : i1 to i32
    %c0_i32_28 = arith.constant 0 : i32
    %40 = arith.cmpi ne, %39, %c0_i32_28 : i32
    scf.if %40 {
      %c0_29 = arith.constant 0 : index
      %c0_30 = arith.constant 0 : index
      %41 = vector.load %arg14[%c0_29, %c0_30] : memref<8x64xf32, #tpu.memory_space<vmem>>, vector<8x64xf32>
      %c0_31 = arith.constant 0 : index
      %c0_32 = arith.constant 0 : index
      %42 = vector.load %arg10[%c0_31, %c0_32] : memref<1x64xf32, #tpu.memory_space<vmem>>, vector<1x64xf32>
      %43 = vector.broadcast %42 : vector<1x64xf32> to vector<8x64xf32>
      %44 = arith.addf %41, %43 : vector<8x64xf32>
      %c0_33 = arith.constant 0 : index
      %c0_34 = arith.constant 0 : index
      %45 = vector.load %arg13[%c0_33, %c0_34] : memref<8x64xf32, #tpu.memory_space<vmem>>, vector<8x64xf32>
      %46 = arith.addf %45, %44 : vector<8x64xf32>
      %47 = vector.shape_cast %46 : vector<8x64xf32> to vector<1x8x64xf32>
      %c0_35 = arith.constant 0 : index
      %c0_36 = arith.constant 0 : index
      %c0_37 = arith.constant 0 : index
      %48 = vector.load %arg11[%c0_35, %c0_36, %c0_37] : memref<1x8x64xf32, #tpu.memory_space<vmem>>, vector<1x8x64xf32>
      tpu.vector_store %arg11[%c0_35, %c0_36, %c0_37], %47 {strides = array<i32>} : memref<1x8x64xf32, #tpu.memory_space<vmem>>, vector<1x8x64xf32>,
    } else {
    }
    return
  }
  func.func @transform_0(%arg0: i32, %arg1: i32) -> (i32, i32, i32) {
    %c0_i32 = arith.constant 0 : i32
    %c0_i32_0 = arith.constant 0 : i32
    %c0_i32_1 = arith.constant 0 : i32
    return %arg0, %c0_i32, %c0_i32_0 : i32, i32, i32
  }
  func.func @transform_1(%arg0: i32, %arg1: i32) -> (i32, i32, i32) {
    %c0_i32 = arith.constant 0 : i32
    %c0_i32_0 = arith.constant 0 : i32
    %c0_i32_1 = arith.constant 0 : i32
    return %arg0, %c0_i32, %c0_i32_0 : i32, i32, i32
  }
  func.func @transform_2(%arg0: i32, %arg1: i32) -> (i32, i32) {
    %c0_i32 = arith.constant 0 : i32
    %c0_i32_0 = arith.constant 0 : i32
    return %c0_i32, %arg1 : i32, i32
  }
  func.func @transform_3(%arg0: i32, %arg1: i32) -> (i32, i32) {
    %c0_i32 = arith.constant 0 : i32
    %c0_i32_0 = arith.constant 0 : i32
    return %c0_i32, %arg1 : i32, i32
  }
  func.func @transform_4(%arg0: i32, %arg1: i32) -> (i32, i32) {
    %c0_i32 = arith.constant 0 : i32
    %c0_i32_0 = arith.constant 0 : i32
    return %c0_i32, %arg1 : i32, i32
  }
  func.func @transform_5(%arg0: i32, %arg1: i32) -> (i32, i32) {
    %c0_i32 = arith.constant 0 : i32
    %c0_i32_0 = arith.constant 0 : i32
    return %c0_i32, %arg1 : i32, i32
  }
  func.func @transform_6(%arg0: i32, %arg1: i32) -> (i32, i32) {
    %c0_i32 = arith.constant 0 : i32
    %c0_i32_0 = arith.constant 0 : i32
    return %arg1, %c0_i32 : i32, i32
  }
  func.func @transform_7(%arg0: i32, %arg1: i32) -> (i32, i32) {
    %c0_i32 = arith.constant 0 : i32
    %c0_i32_0 = arith.constant 0 : i32
    return %arg1, %c0_i32 : i32, i32
  }
  func.func @transform_8(%arg0: i32, %arg1: i32) -> (i32, i32) {
    %c0_i32 = arith.constant 0 : i32
    %c0_i32_0 = arith.constant 0 : i32
    %c0_i32_1 = arith.constant 0 : i32
    return %c0_i32, %c0_i32_0 : i32, i32
  }
  func.func @transform_9(%arg0: i32, %arg1: i32) -> (i32, i32, i32) {
    %c0_i32 = arith.constant 0 : i32
    %c0_i32_0 = arith.constant 0 : i32
    %c0_i32_1 = arith.constant 0 : i32
    return %arg0, %c0_i32, %c0_i32_0 : i32, i32, i32
  }
  func.func @transform_10(%arg0: i32, %arg1: i32) -> (i32, i32, i32) {
    %c0_i32 = arith.constant 0 : i32
    %c0_i32_0 = arith.constant 0 : i32
    %c0_i32_1 = arith.constant 0 : i32
    return %arg0, %c0_i32, %c0_i32_0 : i32, i32, i32
  }
}

</mosaic_0001>

<bundles_post_ra>
// kernel: tpu_custom_call.1
= control target key start
LH: loop header
LB: loop body
LE: loop exit
PB: predicated region body
PF: predicated region fallthrough
CT: control target
= control target key end

     0   :  { %s2168_s0 = inlined_call_operand.vmem [shape: f32[2,8,32], index: 0, kind: input, shape index: {}]   ;;  %s2169_s1 = inlined_call_operand.vmem [shape: f32[2,8,32], index: 1, kind: input, shape index: {}]   ;;  %s2170_s2 = inlined_call_operand.vmem [shape: f32[64,128], index: 2, kind: input, shape index: {}]   ;;  %s2171_s3 = inlined_call_operand.vmem [shape: f32[64,128], index: 3, kind: input, shape index: {}]   ;;  %s2172_s4 = inlined_call_operand.vmem [shape: f32[1,128], index: 4, kind: input, shape index: {}]   ;;  %s2173_s5 = inlined_call_operand.vmem [shape: f32[1,128], index: 5, kind: input, shape index: {}]   ;;  %s2174_s6 = inlined_call_operand.vmem [shape: f32[128,64], index: 6, kind: input, shape index: {}]   ;;  %s2175_s7 = inlined_call_operand.vmem [shape: f32[128,64], index: 7, kind: input, shape index: {}]   ;;  %s2176_s8 = inlined_call_operand.vmem [shape: f32[1,64], index: 8, kind: input, shape index: {}]   ;;  %s2177_s9 = inlined_call_operand.hbm [shape: f32[2,8,64], index: 9, kind: output, shape index: {0}]   ;;  %s2178_s10 = inlined_call_operand.hbm [shape: f32[2,8,8], index: 10, kind: output, shape index: {1}]  }
   0x1   :  { %2181 = sst [smem:[#allocation10_spill]] %s2168_s0 }
   0x2   :  { %2182 = sst [smem:[#allocation11_spill]] %s2169_s1 }
   0x3   :  { %16 = vsyncpa [#allocation5], 0 }
   0x4   :  { %18 = vsyncpa [#allocation5 + $0x1], 0 }
   0x5   :  { %19 = vsyncpa [#allocation7], 0 }
   0x6   :  { %21 = vsyncpa [#allocation7 + $0x1], 0  ;;  %s1799_s13 = smov 0   ;;  %s1801_s14 = smov 0  }
   0x7   :  { %s1803_s15 = smov 0   ;;  %s1805_s16 = smov 0  }
   0x8   :  { %s1807_s17 = smov 0   ;;  %s1809_s18 = smov 0  }
   0x9 LB: > { %s1279_s19 = sadd.s32 4294967295, %s1736_s18   ;;  %s1280_s20 = sadd.s32 4294967294, %s1736_s18   ;;  %s1736_s18 = sphi %s1809_s18, %s27_s18   ;;  %s1732_s17 = sphi %s1807_s17, %s2193_s17   ;;  %s1728_s16 = sphi %s1805_s16, %s2192_s16   ;;  %s1724_s15 = sphi %s1803_s15, %s2191_s15   ;;  %s1720_s14 = sphi %s1801_s14, %s2190_s14   ;;  %s1716_s13 = sphi %s1799_s13, %s2189_s13  }
   0xa   : > { %s39_s21 = sadd.s32 1, %s1732_s17  ;;  %s275_s22 = sadd.s32 1, %s1724_s15 }
   0xb   : > { %p41_p0 = scmp.ge.s32.totalorder %s39_s21, 2  ;;  %p285_p1 = scmp.ne.s32.totalorder %s1724_s15, %s1720_s14 }
   0xc   : > { %p286_p2 = scmp.eq.s32.totalorder %s1279_s19, 1  ;;  %p291_p3 = scmp.ne.s32.totalorder %s1720_s14, %s1716_s13 }
   0xd   : > { %s2195_s21 = smov (%p41_p0, %s39_s21), 0  ;;  %p292_p5 = scmp.eq.s32.totalorder %s1280_s20, 1 }
   0xe   : > { %p1839_p4 = por %p286_p2, %p285_p1  ;;  %s272_s24 = ssub.s32 %s1732_s17, %s2195_s21 }
   0xf   : > { %p1289_p6 = scmp.ge.s32.totalorder %s1736_s18, 1  ;;  %p273_p7 = scmp.eq.s32.totalorder %s272_s24, 0 }
  0x10   : > { %p1846_p8 = por %p292_p5, %p291_p3  ;;  %p397_p9 = scmp.lt.s32.totalorder %s1736_s18, 3 }
  0x11   : > { %s1852_s26 = scalar_select %p273_p7, %s1724_s15, %s275_s22  }
  0x12   : > { %p398_p10 = pnand %p1289_p6, %p397_p9 }
  0x13   : > { %p467_p11 = scmp.lt.s32.totalorder (!%p398_p10), %s1728_s16, 1  ;;  %vm513_vm0 = vcmask (!%p398_p10), 523264   ;;  %v1738_v0 = vmov (!%p398_p10), 0.0   ;;  %vm1739_vm1 = vmmov (!%p398_p10), 0   ;;  %s2185_s1 = sld [smem:[#allocation11_spill]] (!%p398_p10)  ;;  %vm511_vm2 = vcmask (!%p398_p10), 261120  }
  0x14   : > { %401 = sbr.rel (%p398_p10) target bundleno = 1375 (0x55f), region = 56  ;;  %1364 = vmatprep.subr.mxu0 (!%p398_p10), %v1738_v0  ;;  %1369 = vmatprep.subr.mxu1 (!%p398_p10), %v1738_v0  ;;  %676 = vst.msk [vmem:[#allocation3] sm:$0xff] (!%p398_p10), %vm513_vm0, %v1738_v0  ;;  %s1740_s12 = smov (!%p398_p10), 32   ;;  %vm588_vm3 = vcmask (!%p398_p10), 64512   ;;  %v1741_v14 = vmov (!%p398_p10), 0.0|0.0   ;;  %v767_v15 = vld [vmem:[%s2171_s3] sm:$0xff] (!%p398_p10) }
  0x15   : > { %1366 = vmatprep.mubr.msk.f32.mxu0 (!%p398_p10), %vm1739_vm1, %v1738_v0  ;;  %1371 = vmatprep.mubr.msk.f32.mxu1 (!%p398_p10), %vm1739_vm1, %v1738_v0  ;;  %s2186_s0 = sld [smem:[#allocation10_spill]] (!%p398_p10)  ;;  %v768_v16 = vld [vmem:[%s2171_s3 + $0x8] sm:$0xff] (!%p398_p10)  ;;  %s1891_s30 = sand.u32 (!%p398_p10), 1, %s1720_s14   ;;  %v678_v19 = vld [vmem:[%s2170_s2] sm:$0xff] (!%p398_p10)  ;;  %v680_v24 = vld [vmem:[%s2170_s2 + $0x10] sm:$0xff] (!%p398_p10) }
  0x16   : > { %v1495_v17 = vpack.c.bf16 (!%p398_p10), %v768_v16, %v767_v15  ;;  %v679_v20 = vld [vmem:[%s2170_s2 + $0x8] sm:$0xff] (!%p398_p10)  ;;  %v681_v25 = vld [vmem:[%s2170_s2 + $0x18] sm:$0xff] (!%p398_p10)  ;;  %v769_v26 = vld [vmem:[%s2171_s3 + $0x10] sm:$0xff] (!%p398_p10)  ;;  %s1058_s20 = scalar_lea.sflag (!%p398_p10), [#allocation7], %s1891_s30 }
  0x17   : > { %v1483_v22 = vpack.c.bf16 (!%p398_p10), %v679_v20, %v678_v19  ;;  %v1486_v27 = vpack.c.bf16 (!%p398_p10), %v681_v25, %v680_v24  ;;  %v770_v28 = vld [vmem:[%s2171_s3 + $0x18] sm:$0xff] (!%p398_p10)  ;;  %v682_v30 = vld [vmem:[%s2170_s2 + $0x20] sm:$0xff] (!%p398_p10)  ;;  %v683_v31 = vld [vmem:[%s2170_s2 + $0x28] sm:$0xff] (!%p398_p10) }
  0x18   : > { %v1498_v29 = vpack.c.bf16 (!%p398_p10), %v770_v28, %v769_v26  ;;  %v771_v32 = vld [vmem:[%s2171_s3 + $0x20] sm:$0xff] (!%p398_p10)  ;;  %v1489_v33 = vpack.c.bf16 (!%p398_p10), %v683_v31, %v682_v30  ;;  %v772_v34 = vld [vmem:[%s2171_s3 + $0x28] sm:$0xff] (!%p398_p10)  ;;  %v684_v36 = vld [vmem:[%s2170_s2 + $0x30] sm:$0xff] (!%p398_p10) }
  0x19   : > { %v1501_v35 = vpack.c.bf16 (!%p398_p10), %v772_v34, %v771_v32  ;;  %v685_v37 = vld [vmem:[%s2170_s2 + $0x38] sm:$0xff] (!%p398_p10)  ;;  %v773_v38 = vld [vmem:[%s2171_s3 + $0x30] sm:$0xff] (!%p398_p10)  ;;  %v879_v45 = vld [vmem:[%s2175_s7] sm:$0xff] (!%p398_p10) }
  0x1a   : > { %v1492_v39 = vpack.c.bf16 (!%p398_p10), %v685_v37, %v684_v36  ;;  %v774_v40 = vld [vmem:[%s2171_s3 + $0x38] sm:$0xff] (!%p398_p10)  ;;  %v880_v46 = vld [vmem:[%s2175_s7 + $0x8] sm:$0xff] (!%p398_p10)  ;;  %v863_v47 = vld [vmem:[%s2174_s6] sm:$0xff] (!%p398_p10) }
  0x1b   : > { %s468_s27 = scalar_select %p467_p11, %s1728_s16, 1  ;;  %v1504_v41 = vpack.c.bf16 %v774_v40, %v773_v38  ;;  %v864_v48 = vld [vmem:[%s2174_s6 + $0x8] sm:$0xff]  ;;  %v1507_v49 = vpack.c.bf16 %v880_v46, %v879_v45  ;;  %v881_v51 = vld [vmem:[%s2175_s7 + $0x10] sm:$0xff]  ;;  %v882_v52 = vld [vmem:[%s2175_s7 + $0x18] sm:$0xff] }
  0x1c   : > { %v1531_v50 = vpack.c.bf16 %v864_v48, %v863_v47  ;;  %v865_v53 = vld [vmem:[%s2174_s6 + $0x10] sm:$0xff]  ;;  %v866_v54 = vld [vmem:[%s2174_s6 + $0x18] sm:$0xff]  ;;  %v1510_v56 = vpack.c.bf16 %v882_v52, %v881_v51  ;;  %v883_v58 = vld [vmem:[%s2175_s7 + $0x20] sm:$0xff] }
  0x1d   : > { %s1292_s28 = sshll.u32 %s468_s27, 3  ;;  %v1534_v57 = vpack.c.bf16 %v866_v54, %v865_v53  ;;  %v884_v59 = vld [vmem:[%s2175_s7 + $0x28] sm:$0xff]  ;;  %v867_v60 = vld [vmem:[%s2174_s6 + $0x20] sm:$0xff]  ;;  %v873_v15 = vld [vmem:[%s2174_s6 + $0x50] sm:$0xff] }
  0x1e   : > { %s474_s11 = scalar_lea.vmem %s2185_s1, %s1292_s28  ;;  %s470_s22 = scalar_lea.vmem %s2186_s0, %s1292_s28  ;;  %v868_v61 = vld [vmem:[%s2174_s6 + $0x28] sm:$0xff]  ;;  %v1513_v62 = vpack.c.bf16 %v884_v59, %v883_v58  ;;  %v891_v19 = vld [vmem:[%s2175_s7 + $0x60] sm:$0xff]  ;;  %v893_v25 = vld [vmem:[%s2175_s7 + $0x70] sm:$0xff] }
  0x1f   : > { %v506_v1 = vld [vmem:[%s474_s11] sm:$0xff]  ;;  %v1537_v63 = vpack.c.bf16 %v868_v61, %v867_v60  ;;  %v892_v20 = vld [vmem:[%s2175_s7 + $0x68] sm:$0xff]  ;;  %v894_v26 = vld [vmem:[%s2175_s7 + $0x78] sm:$0xff]  ;;  %s1742_s28 = smov [#allocation6]  }
  0x20   : > { %508 = vrot.lane.b32.xlu0 %v506_v1, %s1740_s12  ;;  %v505_v2 = vld [vmem:[%s470_s22] sm:$0xff]  ;;  %s2179_s22 = sshll.u32 %s1891_s30, 3  ;;  %v885_v1 = vld [vmem:[%s2175_s7 + $0x30] sm:$0xff]  ;;  %v1528_v28 = vpack.c.bf16 %v894_v26, %v893_v25  ;;  %s2180_s12 = sshll.u32 %s1728_s16, 7 }
  0x21   : > { %s1903_s24 = scalar_lea.vmem [#allocation6], %s2179_s22  ;;  %v1297_v31 = vld [vmem:[%s2172_s4] ss:$0 sm:$0xff]  ;;  %s2086_s1 = scalar_lea.hbm %s2178_s10, %s2180_s12 }
  0x22   : > { %v1299_v32 = vld [vmem:[%s2173_s5] ss:$0 sm:$0xff]  ;;  %s1084_s22 = sshll.u32 %s1903_s24, 4  ;;  %s1630_s29 = sshll.u32 %s1742_s28, 4  ;;  %s1085_s22 = int_to_ptr.vmem [resolvable:$true] %s1084_s22  ;;  %s1631_s29 = int_to_ptr.vmem [resolvable:$false] %s1630_s29 }
  0x23   : > { %s1626_s27 = scalar_lea.vmem %s1085_s22, 128  ;;  %s1632_s11 = scalar_lea.vmem %s1631_s29, 256 }
  0x24   : > { %p1627_p12 = scmp.ne.s32.totalorder %s1085_s22, %s1626_s27  ;;  %p1633_p1 = scmp.lt.s32.totalorder %s1085_s22, %s1631_s29 }
  0x25   : > { %p1634_p2 = scmp.lt.s32.totalorder %s1632_s11, %s1626_s27 }
  0x26   : > { %p1628_p13 = pnand %p1627_p12, %p1839_p4 }
  0x27   : > { %p1635_p3 = por %p1634_p2, %p1633_p1 }
  0x28   : > { %p1629_p0 = pneg %p1628_p13 }
  0x2a   : > { %p1636_p5 = pnand %p1635_p3, %p1629_p0 }
  0x92   : > { %v509_v3 = vpop.permute.xlu0 %508 }
  0x93   : > { %v1870_v4 = vsel %vm511_vm2, %v505_v2, %v509_v3  ;;  %v869_v2 = vld [vmem:[%s2174_s6 + $0x30] sm:$0xff] }
  0x94   : > { %1365 = vmatpush3.xpose.msk.msra.mxu0 %vm513_vm0, %v1870_v4  ;;  %1370 = vmatpush3.msra.mxu1 %v1870_v4 }
  0x95   : > { %1482 = vmatprep.subr.bf16.mxu1 %v1741_v14  ;;  %1494 = vmatprep.subr.bf16.mxu0 %v1741_v14 }
  0x97   : > { %1367 = vmatmul.mubr.msk.f32.vlgmr.msra.gmra.mrb[0].mxu0 %vm513_vm0, %v1870_v4 }
  0x98   : > { %1409 = vmatprep.mubr.msk.f32.mxu0 %vm1739_vm1, %v1738_v0  ;;  %1496 = vmatpush3.bf16.msra.mxu0 %v1495_v17  ;;  %v874_v17 = vld [vmem:[%s2174_s6 + $0x58] sm:$0xff] }
  0x99   : > { %1497 = vmatprep.subr.bf16.mxu0 %v1741_v14 }
  0x9c   : > { %1499 = vmatpush3.bf16.msra.mxu0 %v1498_v29  ;;  %v878_v29 = vld [vmem:[%s2174_s6 + $0x78] sm:$0xff] }
  0x9d   : > { %1500 = vmatprep.subr.bf16.mxu0 %v1741_v14 }
  0xa0   : > { %1502 = vmatpush3.bf16.msra.mxu0 %v1501_v35 }
  0xa1   : > { %1503 = vmatprep.subr.bf16.mxu0 %v1741_v14 }
  0xa4   : > { %1505 = vmatpush3.bf16.msra.mxu0 %v1504_v41 }
  0xa5   : > { %1530 = vmatprep.subr.bf16.mxu0 %v1741_v14 }
 0x16a   : > { %v583_v5 = vpop.f32.mrb[0].mxu0 }
 0x16b   : > { %v587_v6 = vmul.f32 0.17677669, %v583_v5  ;;  %v1368_v7 = vpop.f32.mrb[1].mxu0 }
 0x16c   : > { %v888_v7 = vld [vmem:[%s2175_s7 + $0x48] sm:$0xff] }
 0x16d   : > { %v589_v8 = vsel %vm588_vm3, %v587_v6, -inf }
 0x16e   : > { %590 = vmax.xlane.f32.xlu0 %v589_v8  ;;  %v871_v8 = vld [vmem:[%s2174_s6 + $0x40] sm:$0xff] }
 0x1fb   : > { %v591_v9 = vpop.xlane.xlu0 %590 }
 0x1fc   : > { %v592_v10 = vsub.f32 %v587_v6, %v591_v9  ;;  %v887_v6 = vld [vmem:[%s2175_s7 + $0x40] sm:$0xff] }
 0x1fd   : > { %v1519_v9 = vpack.c.bf16 %v888_v7, %v887_v6 }
 0x1fe   : > { %v593_v11 = vmul.f32 1.442695, %v592_v10  ;;  %v872_v10 = vld [vmem:[%s2174_s6 + $0x48] sm:$0xff] }
 0x200   : > { %1618 = vpow2.f32 %v593_v11  ;;  %v1543_v11 = vpack.c.bf16 %v872_v10, %v871_v8 }
 0x20a   : > { %v1619_v12 = vpop.eup %1618 }
 0x20b   : > { %v595_v13 = vsel %vm588_vm3, %v1619_v12, 0.0 }
 0x20c   : > { %596 = vadd.xlane.f32.xlu1 %v595_v13  ;;  %v890_v13 = vld [vmem:[%s2175_s7 + $0x58] sm:$0xff] }
 0x299   : > { %v597_v18 = vpop.xlane.xlu1 %596 }
 0x29a   : > { %1620 = vrcp.f32 %v597_v18  ;;  %v1546_v18 = vpack.c.bf16 %v874_v17, %v873_v15 }
 0x2a4   : > { %v1621_v21 = vpop.eup %1620 }
 0x2a5   : > { %v599_v23 = vmul.f32 %v1621_v21, %v1619_v12  ;;  %v889_v12 = vld [vmem:[%s2175_s7 + $0x50] sm:$0xff]  ;;  %v875_v21 = vld [vmem:[%s2174_s6 + $0x60] sm:$0xff] }
 0x2a6   : > { %v1522_v16 = vpack.c.bf16 %v890_v13, %v889_v12 }
 0x2a7   : > { %1372 = vmatmul.mubr.msk.f32.vlgmr.msra.gmra.mrb[0].mxu1 %vm588_vm3, %v599_v23  ;;  %600 = vst.msk [vmem:[%s1903_s24] sm:$0xff] %vm588_vm3, %v599_v23  ;;  %v876_v23 = vld [vmem:[%s2174_s6 + $0x68] sm:$0xff] }
 0x2a8   : > { %1484 = vmatpush3.bf16.msra.mxu1 %v1483_v22  ;;  %1390 = vmatprep.mubr.msk.f32.mxu1 %vm1739_vm1, %v1738_v0  ;;  %v1525_v22 = vpack.c.bf16 %v892_v20, %v891_v19  ;;  %v1549_v24 = vpack.c.bf16 %v876_v23, %v875_v21 }
 0x2a9   : > { %1485 = vmatprep.subr.bf16.mxu1 %v1741_v14 }
 0x2ac   : > { %1487 = vmatpush3.bf16.msra.mxu1 %v1486_v27  ;;  %v877_v27 = vld [vmem:[%s2174_s6 + $0x70] sm:$0xff] }
 0x2ad   : > { %1488 = vmatprep.subr.bf16.mxu1 %v1741_v14  ;;  %v1552_v30 = vpack.c.bf16 %v878_v29, %v877_v27 }
 0x2b0   : > { %1490 = vmatpush3.bf16.msra.mxu1 %v1489_v33 }
 0x2b1   : > { %1491 = vmatprep.subr.bf16.mxu1 %v1741_v14 }
 0x2b4   : > { %1493 = vmatpush3.bf16.msra.mxu1 %v1492_v39 }
 0x2b5   : > { %1506 = vmatprep.subr.bf16.mxu1 %v1741_v14 }
 0x37a   : > { %v670_v42 = vpop.f32.mrb[0].mxu1 }
 0x37b   : > { %v674_v43 = vadd.f32 %v670_v42, %v1870_v4  ;;  %v1373_v44 = vpop.f32.mrb[1].mxu1  ;;  %v870_v4 = vld [vmem:[%s2174_s6 + $0x38] sm:$0xff] }
 0x37c   : > { %v1540_v5 = vpack.c.bf16 %v870_v4, %v869_v2 }
 0x37d   : > { %675 = vst.msk [vmem:[#allocation2] sm:$0xff] %vm513_vm0, %v674_v43 }
 0x384   : > { %v1978_v55 = vld [vmem:[#allocation2] sm:$0xff] }
 0x385   : > { %1391 = vmatmul.mubr.msk.f32.vlgmr.msra.gmra.mrb[2].mxu1 %vm513_vm0, %v1978_v55  ;;  %1410 = vmatmul.mubr.msk.f32.vlgmr.msra.gmra.mrb[2].mxu0 %vm513_vm0, %v1978_v55 }
 0x386   : > { %1508 = vmatpush3.bf16.msra.mxu1 %v1507_v49  ;;  %1532 = vmatpush3.bf16.msra.mxu0 %v1531_v50 }
 0x387   : > { %1509 = vmatprep.subr.bf16.mxu1 %v1741_v14  ;;  %1533 = vmatprep.subr.bf16.mxu0 %v1741_v14 }
 0x388   : > { %1444 = vmatprep.mubr.msk.f32.mxu1 %vm1739_vm1, %v1738_v0  ;;  %1479 = vmatprep.mubr.msk.f32.mxu0 %vm1739_vm1, %v1738_v0  ;;  %v886_v0 = vld [vmem:[%s2175_s7 + $0x38] sm:$0xff] }
 0x389   : > { %v1516_v3 = vpack.c.bf16 %v886_v0, %v885_v1 }
 0x38a   : > { %1511 = vmatpush3.bf16.msra.mxu1 %v1510_v56  ;;  %1535 = vmatpush3.bf16.msra.mxu0 %v1534_v57 }
 0x38b   : > { %1512 = vmatprep.subr.bf16.mxu1 %v1741_v14  ;;  %1536 = vmatprep.subr.bf16.mxu0 %v1741_v14 }
 0x38e   : > { %1514 = vmatpush3.bf16.msra.mxu1 %v1513_v62  ;;  %1538 = vmatpush3.bf16.msra.mxu0 %v1537_v63 }
 0x38f   : > { %1515 = vmatprep.subr.bf16.mxu1 %v1741_v14  ;;  %1539 = vmatprep.subr.bf16.mxu0 %v1741_v14 }
 0x392   : > { %1517 = vmatpush3.bf16.msra.mxu1 %v1516_v3  ;;  %1541 = vmatpush3.bf16.msra.mxu0 %v1540_v5 }
 0x393   : > { %1518 = vmatprep.subr.bf16.mxu1 %v1741_v14  ;;  %1542 = vmatprep.subr.bf16.mxu0 %v1741_v14 }
 0x396   : > { %1520 = vmatpush3.bf16.msra.mxu1 %v1519_v9  ;;  %1544 = vmatpush3.bf16.msra.mxu0 %v1543_v11 }
 0x397   : > { %1521 = vmatprep.subr.bf16.mxu1 %v1741_v14  ;;  %1545 = vmatprep.subr.bf16.mxu0 %v1741_v14 }
 0x39a   : > { %1523 = vmatpush3.bf16.msra.mxu1 %v1522_v16  ;;  %1547 = vmatpush3.bf16.msra.mxu0 %v1546_v18 }
 0x39b   : > { %1524 = vmatprep.subr.bf16.mxu1 %v1741_v14  ;;  %1548 = vmatprep.subr.bf16.mxu0 %v1741_v14 }
 0x39e   : > { %1526 = vmatpush3.bf16.msra.mxu1 %v1525_v22  ;;  %1550 = vmatpush3.bf16.msra.mxu0 %v1549_v24 }
 0x39f   : > { %1527 = vmatprep.subr.bf16.mxu1 %v1741_v14  ;;  %1551 = vmatprep.subr.bf16.mxu0 %v1741_v14 }
 0x3a2   : > { %1529 = vmatpush3.bf16.msra.mxu1 %v1528_v28  ;;  %1553 = vmatpush3.bf16.msra.mxu0 %v1552_v30 }
 0x458   : > { %v763_v33 = vpop.f32.mrb[2].mxu1  ;;  %v848_v34 = vpop.f32.mrb[2].mxu0 }
 0x459   : > { %v764_v35 = vadd.f32 %v1297_v31, %v763_v33  ;;  %v849_v14 = vadd.f32 %v1299_v32, %v848_v34  ;;  %v1392_v36 = vpop.f32.mrb[3].mxu1  ;;  %v1411_v37 = vpop.f32.mrb[3].mxu0 }
 0x45b   : > { %v853_v38 = vmul.f32 0.70710677, %v764_v35  ;;  %v858_v39 = vmul.f32 0.70710677, %v849_v14  ;;  %v852_v42 = vmul.f32 0.5, %v764_v35  ;;  %v857_v44 = vmul.f32 0.5, %v849_v14 }
 0x45d   : > { %1622 = verf.f32 %v853_v38 }
 0x45e   : > { %1624 = verf.f32 %v858_v39 }
 0x467   : > { %v1623_v40 = vpop.eup %1622 }
 0x468   : > { %v1625_v41 = vpop.eup %1624  ;;  %v855_v43 = vadd.f32 1.0, %v1623_v40 }
 0x469   : > { %v860_v45 = vadd.f32 1.0, %v1625_v41 }
 0x46a   : > { %v856_v46 = vmul.f32 %v855_v43, %v852_v42 }
 0x46b   : > { %v861_v47 = vmul.f32 %v860_v45, %v857_v44 }
 0x46c   : > { %1480 = vmatmul.mubr.f32.vlgmr.msra.gmra.mrb[4].mxu0 %v856_v46 }
 0x46d   : > { %1445 = vmatmul.mubr.f32.vlgmr.msra.gmra.mrb[4].mxu1 %v861_v47 }
 0x46e   : > { %1639 = shalt.err (!%p1636_p5)
}
 0x46f   : > { %s1640_s24 = scalar_lea.hbm %s2086_s1, 128  ;;  %s1644_s28 = scalar_lea.hbm %s2178_s10, 256 }
 0x470   : > { %p1641_p6 = scmp.ne.s32.totalorder %s2086_s1, %s1640_s24  ;;  %p1645_p10 = scmp.lt.u32.totalorder %s2086_s1, %s2178_s10 }
 0x471   : > { %p1646_p11 = scmp.lt.u32.totalorder %s1644_s28, %s1640_s24  ;;  %p1648_p13 = scmp.lt.u32.totalorder %s1640_s24, %s2086_s1 }
 0x472   : > { %p1642_p7 = pnand %p1641_p6, %p1839_p4 }
 0x473   : > { %p1647_p12 = por %p1646_p11, %p1645_p10 }
 0x474   : > { %p1643_p9 = pneg %p1642_p7 }
 0x475   : > { %p1649_p0 = por %p1648_p13, %p1647_p12 }
 0x477   : > { %p1650_p1 = pnand %p1649_p0, %p1643_p9 }
 0x479   : > { %1653 = shalt.err (!%p1650_p1)
}
 0x47a   : > { %1555 = dma.vmem_to_hbm [thread:$0]  (%p1839_p4), %s1085_s22, 128, %s2086_s1, %s1058_s20   ;;  %v862_v50 = vld [vmem:[#allocation3] sm:$0xff]  ;;  %v1301_v56 = vld [vmem:[%s2176_s8] ss:$0 sm:$0xff] }
 0x47b   : > { %s2187_s11 = sshll.u32 %s1891_s30, 3  ;;  %s2188_s1 = sshll.u32 %s1728_s16, 7 }
 0x47c   : > { %s459_s24 = scalar_lea.vmem [#allocation4], %s2187_s11  ;;  %s2119_s0 = scalar_lea.hbm %s2177_s9, %s2188_s1 }
 0x47d   : > { %s1071_s19 = sshll.u32 %s459_s24, 4  ;;  %s1053_s28 = scalar_lea.sflag [#allocation5], %s1891_s30  ;;  %s2121_s19 = int_to_ptr.vmem [resolvable:$true] %s1071_s19 }
 0x47e   : > { %s1654_s29 = scalar_lea.vmem %s2121_s19, 128  ;;  %s1743_s12 = smov [#allocation4]  }
 0x47f   : > { %p1655_p2 = scmp.ne.s32.totalorder %s2121_s19, %s1654_s29  ;;  %s1658_s16 = sshll.u32 %s1743_s12, 4  ;;  %s1659_s16 = int_to_ptr.vmem [resolvable:$false] %s1658_s16 }
 0x480   : > { %s1660_s27 = scalar_lea.vmem %s1659_s16, 256  ;;  %p1661_p6 = scmp.lt.s32.totalorder %s2121_s19, %s1659_s16 }
 0x481   : > { %p1656_p3 = pnand %p1655_p2, %p1839_p4  ;;  %p1662_p7 = scmp.lt.s32.totalorder %s1660_s27, %s1654_s29 }
 0x483   : > { %p1657_p5 = pneg %p1656_p3  ;;  %p1663_p9 = por %p1662_p7, %p1661_p6 }
 0x485   : > { %p1664_p10 = pnand %p1663_p9, %p1657_p5 }
 0x53f   : > { %v1031_v48 = vpop.f32.mrb[4].mxu0 }
 0x540   : > { %v961_v49 = vpop.f32.mrb[4].mxu1  ;;  %v1481_v51 = vpop.f32.mrb[5].mxu0 }
 0x541   : > { %v1032_v52 = vadd.f32 %v1031_v48, %v961_v49  ;;  %v1446_v53 = vpop.f32.mrb[5].mxu1 }
 0x543   : > { %v1035_v54 = vadd.f32 %v1032_v52, %v862_v50 }
 0x545   : > { %1036 = vst.msk [vmem:[#allocation3] sm:$0xff] %vm513_vm0, %v1035_v54 }
 0x54c   : > { %v1040_v57 = vld [vmem:[#allocation3] sm:$0xff] }
 0x54d   : > { %v1048_v58 = vadd.f32 %v1301_v56, %v1040_v57 }
 0x54f   : > { %v1050_v59 = vadd.f32 %v1048_v58, %v1978_v55 }
 0x551   : > { %1051 = vst.msk [vmem:[%s459_s24] sm:$0xff] %vm513_vm0, %v1050_v59 }
 0x552   : > { %1667 = shalt.err (!%p1664_p10)
}
 0x553   : > { %s1668_s30 = scalar_lea.hbm %s2119_s0, 128  ;;  %s1672_s1 = scalar_lea.hbm %s2177_s9, 256 }
 0x554   : > { %p1669_p11 = scmp.ne.s32.totalorder %s2119_s0, %s1668_s30  ;;  %p1673_p0 = scmp.lt.u32.totalorder %s2119_s0, %s2177_s9 }
 0x555   : > { %p1674_p1 = scmp.lt.u32.totalorder %s1672_s1, %s1668_s30  ;;  %p1676_p3 = scmp.lt.u32.totalorder %s1668_s30, %s2119_s0 }
 0x556   : > { %p1670_p12 = pnand %p1669_p11, %p1839_p4 }
 0x557   : > { %p1675_p2 = por %p1674_p1, %p1673_p0 }
 0x558   : > { %p1671_p13 = pneg %p1670_p12 }
 0x559   : > { %p1677_p5 = por %p1676_p3, %p1675_p2 }
 0x55b   : > { %p1678_p6 = pnand %p1677_p5, %p1671_p13 }
 0x55d   : > { %1681 = shalt.err (!%p1678_p6)
}
 0x55e   : > { %1554 = dma.vmem_to_hbm [thread:$0]  (%p1839_p4), %s2121_s19, 128, %s2119_s0, %s1053_s28  }
 0x55f PF: > { %p1565_p7 = scmp.ge.s32.totalorder %s1736_s18, 2  ;;  %s1096_s29 = sand.u32 1, %s1716_s13  }
 0x560   : > { %s1097_s12 = scalar_lea.sflag [#allocation5], %s1096_s29 }
 0x561   : > { %p1559_p9 = pnand %p1565_p7, %p1846_p8 }
 0x563   : > { %1707 = dma.done.wait (!%p1559_p9), %s1097_s12, 128  }
 0x564   : > { %1709 = vsyncadd (!%p1559_p9), %s1097_s12, 4294967168  ;;  %s1106_s16 = scalar_lea.sflag [#allocation7], %s1096_s29 }
 0x565   : > { %1711 = dma.done.wait (!%p1559_p9), %s1106_s16, 128  }
 0x566   : > { %1713 = vsyncadd (!%p1559_p9), %s1106_s16, 4294967168  ;;  %s27_s18 = sadd.s32 1, %s1736_s18   ;;  %s2189_s13 = smov %s1720_s14 }
 0x567   : > { %p24_p10 = scmp.ge.s32.totalorder %s27_s18, 4   ;;  %s2190_s14 = smov %s1724_s15 }
 0x568   : > { %s2191_s15 = smov %s1852_s26  ;;  %s2192_s16 = smov %s1732_s17 }
 0x569   : > { %s2193_s17 = smov %s2195_s21  ;;  %26 = sbr.rel (!%p24_p10) target bundleno = 9 (0x9), region = 137 }
 0x570   :  { %1111 = vsyncpa [#allocation5], 1 }
 0x571   :  { %1113 = vsyncpa [#allocation5 + $0x1], 1 }
 0x572   :  { %1114 = vsyncpa [#allocation7], 1 }
 0x573   :  { %1116 = vsyncpa [#allocation7 + $0x1], 1 }

</bundles_post_ra>
